<compile_context>
chip_gen: v6e
topology: v6e:2x2x1
jax: 0.10.0
libtpu: 0.0.40
codegen_flags: <defaults>
</compile_context>

<pallas_src>
import functools
import math

import jax
import jax.numpy as jnp
import numpy as np
from jax import lax
from jax.experimental import pallas as pl
from jax.experimental.pallas import tpu as pltpu

_NEG_INF = float(np.finfo(np.float32).min)


def _mhsa_kernel(xq_ref, xk_ref, xv_ref, bias_ref,
                 wq_ref, wk_ref, wv_ref, wo_ref,
                 bq_ref, bk_ref, bv_ref, bo_ref,
                 out_ref,
                 acc_ref, kh_ref, vh_ref,
                 *, heads_per_group, head_dim, compute_dtype, exp_dtype,
                 approx_reciprocal):
    """One (batch, q_tile, head_group) grid step of fused multi-head self-attention."""
    qi = pl.program_id(1)
    g = pl.program_id(2)
    last_g = pl.num_programs(2) - 1

    @pl.when(g == 0)
    def _init():
        # Output-projection bias is added exactly once per (batch, q_tile).
        acc_ref[...] = jnp.broadcast_to(bo_ref[...], acc_ref.shape)

    # K/V projections for this head group at full group width: computed once per
    # batch element (qi == 0), cached in VMEM, reused across query tiles.
    @pl.when(qi == 0)
    def _project_kv():
        xk = xk_ref[0]                                            # (S, D)
        xv = xv_ref[0]
        kh = jnp.dot(xk, wk_ref[g], preferred_element_type=jnp.float32) + bk_ref[g]
        vh = jnp.dot(xv, wv_ref[g], preferred_element_type=jnp.float32) + bv_ref[g]
        kh_ref[g] = kh.astype(compute_dtype)                      # (S, gd)
        vh_ref[g] = vh.astype(compute_dtype)

    # Q projection for this (q_tile, head group); 1/sqrt(hd) folded into wq/bq.
    xq = xq_ref[0]                                                # (tq, D)
    qh = (jnp.dot(xq, wq_ref[g], preferred_element_type=jnp.float32)
          + bq_ref[g]).astype(compute_dtype)                      # (tq, gd)

    kh = kh_ref[g]                                                # (S, gd)
    vh = vh_ref[g]
    bias = bias_ref[0]                                            # (1, S) additive mask (f32)

    # Per-head attention inside the group (short unrolled loop, static lane slices).
    ctx_parts = []
    for h in range(heads_per_group):
        lo = h * head_dim
        q_h = qh[:, lo:lo + head_dim]                             # (tq, hd)
        k_h = kh[:, lo:lo + head_dim]                             # (S,  hd)
        v_h = vh[:, lo:lo + head_dim]                             # (S,  hd)

        # scores = q_h @ k_h^T expressed as a contraction (no explicit XLU transpose).
        scores = lax.dot_general(q_h, k_h,
                                 dimension_numbers=(((1,), (1,)), ((), ())),
                                 preferred_element_type=jnp.float32)  # (tq, S)
        scores = scores + bias

        # Numerically-stable softmax with deferred normalization: max-subtract and
        # denominator accumulation in f32; exponent in exp_dtype (bf16 on v6e/v7x).
        m = jnp.max(scores, axis=-1, keepdims=True)
        p = jnp.exp((scores - m).astype(exp_dtype))
        denom = jnp.sum(p, axis=-1, keepdims=True, dtype=jnp.float32)

        # Attention dropout is identity in eval mode; head_mask is None.
        ctx_h = jnp.dot(p.astype(compute_dtype), v_h,
                        preferred_element_type=jnp.float32)       # (tq, hd)
        ctx_h = ctx_h * pl.reciprocal(denom, approx=approx_reciprocal)
        ctx_parts.append(ctx_h.astype(compute_dtype))

    ctx_g = ctx_parts[0] if heads_per_group == 1 else jnp.concatenate(ctx_parts, axis=-1)

    # Accumulate this group's slice of the output projection (full gd-wide contraction):
    #   out = sum_g ctx_g @ Wo.T[g*gd:(g+1)*gd, :] + bo
    acc_ref[...] += jnp.dot(ctx_g, wo_ref[g], preferred_element_type=jnp.float32)

    @pl.when(g == last_g)
    def _finalize():
        out_ref[0] = acc_ref[...].astype(out_ref.dtype)


def _choose_heads_per_group(n_heads, head_dim, target_width=256):
    """Largest divisor of n_heads whose group width g*head_dim fits the MXU target."""
    for g in range(n_heads, 0, -1):
        if n_heads % g == 0 and g * head_dim <= target_width:
            return g
    return 1


def prepare_params(params, *, n_heads, compute_dtype=jnp.bfloat16,
                   exp_dtype=None, out_dtype=None, mxu_target_width=256):
    """One-time parameter prep (hoisted out of the hot path).

    Takes PyTorch nn.Linear-convention params: weight (out, in), bias (out,).
    Returns pre-transposed, head-group-major, pre-scaled weights.
      * mxu_target_width: 256 for v6e/v7x, 128 for v5e.
      * exp_dtype: softmax exponent dtype; defaults to compute_dtype
        (pass jnp.float32 on v5e — its EUP has no bf16 path).
      * out_dtype: output dtype; defaults to the query dtype.
    """
    D = params["wq"].shape[0]
    if D % n_heads != 0:
        raise ValueError(f"n_heads={n_heads} must divide dim={D}")
    hd = D // n_heads
    G = _choose_heads_per_group(n_heads, hd, mxu_target_width)
    n_groups = n_heads // G
    gd = G * hd
    scale = 1.0 / math.sqrt(hd)

    def in_by_group(w):   # (out, in) -> (n_groups, in, gd):  x @ w.T split by head group
        return jnp.transpose(w.T.reshape(D, n_groups, gd), (1, 0, 2))

    return {
        "wq_g": in_by_group(params["wq"] * scale).astype(compute_dtype),
        "wk_g": in_by_group(params["wk"]).astype(compute_dtype),
        "wv_g": in_by_group(params["wv"]).astype(compute_dtype),
        # Output projection consumes group-major context rows: Wo.T -> (n_groups, gd, D).
        "wo_g": params["wo"].T.reshape(n_groups, gd, D).astype(compute_dtype),
        "bq_g": (params["bq"] * scale).reshape(n_groups, 1, gd).astype(jnp.float32),
        "bk_g": params["bk"].reshape(n_groups, 1, gd).astype(jnp.float32),
        "bv_g": params["bv"].reshape(n_groups, 1, gd).astype(jnp.float32),
        "bo": params["bo"].reshape(1, D).astype(jnp.float32),
        "n_heads": n_heads,
        "heads_per_group": G,
        "compute_dtype": compute_dtype,
        "exp_dtype": exp_dtype if exp_dtype is not None else compute_dtype,
        "out_dtype": out_dtype,
        "approx_reciprocal": compute_dtype != jnp.float32,
    }


def _choose_q_tile(seq_len):
    # Full sequence as one query tile while it comfortably fits VMEM; otherwise tile.
    if seq_len <= 512:
        return seq_len
    for t in (512, 256, 128, 64):
        if seq_len % t == 0:
            return t
    # TODO(synk): pad / handle ragged q tiles for long odd sequence lengths; the
    # single-tile fallback can make the (S, S) f32 score intermediates VMEM-heavy.
    return seq_len


def _vmem_limit_bytes(S, D, tq, itemsize):
    act = 2 * (tq * D + 2 * S * D) * itemsize        # double-buffered q/k/v blocks
    outb = 2 * tq * D * itemsize                     # double-buffered output block
    wts = 2 * 4 * D * D * itemsize                   # resident q/k/v/o weights (x2 margin)
    scr = 2 * S * D * itemsize + 4 * tq * D          # kh/vh cache + f32 accumulator
    tmp = 4 * (2 * tq * S + 4 * tq * D)              # f32 scores/p + per-group temporaries
    est = act + outb + wts + scr + tmp + (4 << 20)   # + Mosaic internal headroom
    return int(min(max(est, 16 << 20), 48 << 20))    # stay well under v7x's 64 MiB/TC


def multi_head_self_attention(query, key, value, mask, prepared):
    """query/key/value: (bs, S, D); mask: (bs, S) with 1 = keep, 0 = mask out."""
    bs, S, D = query.shape
    n_heads = prepared["n_heads"]
    G = prepared["heads_per_group"]
    hd = D // n_heads
    gd = G * hd
    n_groups = n_heads // G
    compute_dtype = prepared["compute_dtype"]
    out_dtype = prepared["out_dtype"] if prepared["out_dtype"] is not None else query.dtype

    tq = _choose_q_tile(S)
    n_q = S // tq

    # Additive attention-mask bias, computed once per call in the wrapper.
    mask_bias = jnp.where(mask == 0, _NEG_INF, 0.0).astype(jnp.float32).reshape(bs, 1, S)

    # Cast activations once in the wrapper (halves K/V DMA + VMEM on the bf16 path).
    q_in = query.astype(compute_dtype)
    k_in = key.astype(compute_dtype)
    v_in = value.astype(compute_dtype)

    kernel = functools.partial(
        _mhsa_kernel,
        heads_per_group=G, head_dim=hd,
        compute_dtype=compute_dtype,
        exp_dtype=prepared["exp_dtype"],
        approx_reciprocal=prepared["approx_reciprocal"])

    q_spec = pl.BlockSpec((1, tq, D), lambda b, qi, g: (b, qi, 0))
    kv_spec = pl.BlockSpec((1, S, D), lambda b, qi, g: (b, 0, 0))
    bias_spec = pl.BlockSpec((1, 1, S), lambda b, qi, g: (b, 0, 0))
    # Weights/biases: full-array blocks with constant index maps -> DMA'd once and
    # resident in VMEM across the whole grid; the kernel indexes them with [g].
    w_in_spec = pl.BlockSpec((n_groups, D, gd), lambda b, qi, g: (0, 0, 0))
    w_out_spec = pl.BlockSpec((n_groups, gd, D), lambda b, qi, g: (0, 0, 0))
    b_in_spec = pl.BlockSpec((n_groups, 1, gd), lambda b, qi, g: (0, 0, 0))
    bo_spec = pl.BlockSpec((1, D), lambda b, qi, g: (0, 0))
    out_spec = pl.BlockSpec((1, tq, D), lambda b, qi, g: (b, qi, 0))

    # The q-tile axis must stay "arbitrary" when n_q > 1 so the per-batch K/V cache
    # (filled at qi == 0) is always computed before it is reused on the same core.
    q_axis_sem = "parallel" if n_q == 1 else "arbitrary"

    return pl.pallas_call(
        kernel,
        out_shape=jax.ShapeDtypeStruct((bs, S, D), out_dtype),
        grid=(bs, n_q, n_groups),
        in_specs=[q_spec, kv_spec, kv_spec, bias_spec,
                  w_in_spec, w_in_spec, w_in_spec, w_out_spec,
                  b_in_spec, b_in_spec, b_in_spec, bo_spec],
        out_specs=out_spec,
        scratch_shapes=[
            pltpu.VMEM((tq, D), jnp.float32),               # resident output accumulator
            pltpu.VMEM((n_groups, S, gd), compute_dtype),   # cached K group projections
            pltpu.VMEM((n_groups, S, gd), compute_dtype),   # cached V group projections
        ],
        compiler_params=pltpu.CompilerParams(
            dimension_semantics=("parallel", q_axis_sem, "arbitrary"),
            vmem_limit_bytes=_vmem_limit_bytes(
                S, D, tq, jnp.dtype(compute_dtype).itemsize)),
    )(q_in, k_in, v_in, mask_bias,
      prepared["wq_g"], prepared["wk_g"], prepared["wv_g"], prepared["wo_g"],
      prepared["bq_g"], prepared["bk_g"], prepared["bv_g"], prepared["bo"])


def _reference(query, key, value, mask, params, *, n_heads):
    """Pure-JAX reference mirroring the PyTorch forward."""
    bs, S, D = query.shape
    hd = D // n_heads

    def lin(x, w, b):
        return x @ w.T + b

    def split_heads(x):
        return x.reshape(bs, S, n_heads, hd).transpose(0, 2, 1, 3)  # (bs, H, S, hd)

    q = split_heads(lin(query, params["wq"], params["bq"])) / math.sqrt(hd)
    k = split_heads(lin(key, params["wk"], params["bk"]))
    v = split_heads(lin(value, params["wv"], params["bv"]))

    scores = jnp.einsum("bhqd,bhkd->bhqk", q, k)
    neg = (mask == 0).reshape(bs, 1, 1, S)
    scores = jnp.where(neg, jnp.finfo(scores.dtype).min, scores)
    weights = jax.nn.softmax(scores, axis=-1)
    ctx = jnp.einsum("bhqk,bhkd->bhqd", weights, v)
    ctx = ctx.transpose(0, 2, 1, 3).reshape(bs, S, D)
    return lin(ctx, params["wo"], params["bo"])


if __name__ == "__main__":
    bs, S, D, n_heads = 2, 8, 32, 4

    key0 = jax.random.PRNGKey(0)
    keys = jax.random.split(key0, 12)

    # Deterministic synthetic parameters (PyTorch nn.Linear shapes: weight (out,in), bias (out,)).
    params = {
        "wq": 0.05 * jax.random.normal(keys[0], (D, D), jnp.float32),
        "bq": 0.05 * jax.random.normal(keys[1], (D,), jnp.float32),
        "wk": 0.05 * jax.random.normal(keys[2], (D, D), jnp.float32),
        "bk": 0.05 * jax.random.normal(keys[3], (D,), jnp.float32),
        "wv": 0.05 * jax.random.normal(keys[4], (D, D), jnp.float32),
        "bv": 0.05 * jax.random.normal(keys[5], (D,), jnp.float32),
        "wo": 0.05 * jax.random.normal(keys[6], (D, D), jnp.float32),
        "bo": 0.05 * jax.random.normal(keys[7], (D,), jnp.float32),
    }

    query = jax.random.normal(keys[8], (bs, S, D), jnp.float32)
    key_t = jax.random.normal(keys[9], (bs, S, D), jnp.float32)
    value = jax.random.normal(keys[10], (bs, S, D), jnp.float32)

    # Attention mask: 1 = attend, 0 = masked (pad last two positions of batch 1).
    mask = jnp.ones((bs, S), jnp.int32).at[1, -2:].set(0)

    ref = _reference(query, key_t, value, mask, params, n_heads=n_heads)

    # 1) Full-f32 compute path: strict check against the pure-JAX reference.
    prep_f32 = prepare_params(params, n_heads=n_heads, compute_dtype=jnp.float32)
    out_f32 = jax.block_until_ready(
        multi_head_self_attention(query, key_t, value, mask, prep_f32))
    np.testing.assert_allclose(np.asarray(out_f32), np.asarray(ref),
                               rtol=1e-4, atol=1e-5)

    # 2) Default perf path: bf16 activations/weights/exp, bf16 output; looser check.
    prep_bf16 = prepare_params(params, n_heads=n_heads,
                               compute_dtype=jnp.bfloat16, out_dtype=jnp.bfloat16)
    out_bf16 = jax.block_until_ready(
        multi_head_self_attention(query, key_t, value, mask, prep_bf16))
    np.testing.assert_allclose(np.asarray(out_bf16).astype(np.float32), np.asarray(ref),
                               rtol=3e-2, atol=3e-2)

    print("KERNEL_OK")
</pallas_src>

<mosaic_0001>
module attributes {stable_mosaic.version = 11 : i64} {
  func.func @_mhsa_kernel(%arg0: i32, %arg1: i32, %arg2: i32, %arg3: memref<1x8x32xf32, #tpu.memory_space<vmem>>, %arg4: memref<1x8x32xf32, #tpu.memory_space<vmem>>, %arg5: memref<1x8x32xf32, #tpu.memory_space<vmem>>, %arg6: memref<1x1x8xf32, #tpu.memory_space<vmem>>, %arg7: memref<1x32x32xf32, #tpu.memory_space<vmem>>, %arg8: memref<1x32x32xf32, #tpu.memory_space<vmem>>, %arg9: memref<1x32x32xf32, #tpu.memory_space<vmem>>, %arg10: memref<1x32x32xf32, #tpu.memory_space<vmem>>, %arg11: memref<1x1x32xf32, #tpu.memory_space<vmem>>, %arg12: memref<1x1x32xf32, #tpu.memory_space<vmem>>, %arg13: memref<1x1x32xf32, #tpu.memory_space<vmem>>, %arg14: memref<1x32xf32, #tpu.memory_space<vmem>>, %arg15: memref<1x8x32xf32, #tpu.memory_space<vmem>>, %arg16: memref<8x32xf32, #tpu.memory_space<vmem>>, %arg17: memref<1x8x32xf32, #tpu.memory_space<vmem>>, %arg18: memref<1x8x32xf32, #tpu.memory_space<vmem>>) attributes {dimension_semantics = [#tpu.dimension_semantics<parallel>, #tpu.dimension_semantics<parallel>, #tpu.dimension_semantics<arbitrary>], iteration_bounds = array<i64: 2, 1, 1>, scalar_prefetch = 0 : i64, scratch_operands = 3 : i64, tpu.core_type = #tpu.core_type<tc>, window_params = [{transform_indices = @transform_0, window_bounds = array<i64: 1, 8, 32>}, {transform_indices = @transform_1, window_bounds = array<i64: 1, 8, 32>}, {transform_indices = @transform_2, window_bounds = array<i64: 1, 8, 32>}, {transform_indices = @transform_3, window_bounds = array<i64: 1, 1, 8>}, {pipeline_mode = #tpu.pipeline_mode<synchronous>, transform_indices = @transform_4, window_bounds = array<i64: 1, 32, 32>}, {pipeline_mode = #tpu.pipeline_mode<synchronous>, transform_indices = @transform_5, window_bounds = array<i64: 1, 32, 32>}, {pipeline_mode = #tpu.pipeline_mode<synchronous>, transform_indices = @transform_6, window_bounds = array<i64: 1, 32, 32>}, {pipeline_mode = #tpu.pipeline_mode<synchronous>, transform_indices = @transform_7, window_bounds = array<i64: 1, 32, 32>}, {pipeline_mode = #tpu.pipeline_mode<synchronous>, transform_indices = @transform_8, window_bounds = array<i64: 1, 1, 32>}, {pipeline_mode = #tpu.pipeline_mode<synchronous>, transform_indices = @transform_9, window_bounds = array<i64: 1, 1, 32>}, {pipeline_mode = #tpu.pipeline_mode<synchronous>, transform_indices = @transform_10, window_bounds = array<i64: 1, 1, 32>}, {pipeline_mode = #tpu.pipeline_mode<synchronous>, transform_indices = @transform_11, window_bounds = array<i64: 1, 32>}, {transform_indices = @transform_12, window_bounds = array<i64: 1, 8, 32>}]} {
    %c0_i32 = arith.constant 0 : i32
    %0 = arith.cmpi eq, %arg2, %c0_i32 : i32
    %1 = arith.extui %0 : i1 to i32
    %c0_i32_0 = arith.constant 0 : i32
    %2 = arith.cmpi ne, %1, %c0_i32_0 : i32
    scf.if %2 {
      %c0_41 = arith.constant 0 : index
      %c0_42 = arith.constant 0 : index
      %104 = vector.load %arg14[%c0_41, %c0_42] : memref<1x32xf32, #tpu.memory_space<vmem>>, vector<1x32xf32>
      %105 = vector.shape_cast %104 : vector<1x32xf32> to vector<1x32xf32>
      %106 = vector.broadcast %105 : vector<1x32xf32> to vector<8x32xf32>
      %c0_43 = arith.constant 0 : index
      %c0_44 = arith.constant 0 : index
      %107 = vector.load %arg16[%c0_43, %c0_44] : memref<8x32xf32, #tpu.memory_space<vmem>>, vector<8x32xf32>
      tpu.vector_store %arg16[%c0_43, %c0_44], %106 {strides = array<i32>} : memref<8x32xf32, #tpu.memory_space<vmem>>, vector<8x32xf32>,
    } else {
    }
    %c0_i32_1 = arith.constant 0 : i32
    %3 = arith.cmpi eq, %arg1, %c0_i32_1 : i32
    %4 = arith.extui %3 : i1 to i32
    %c0_i32_2 = arith.constant 0 : i32
    %5 = arith.cmpi ne, %4, %c0_i32_2 : i32
    scf.if %5 {
      %c0_41 = arith.constant 0 : index
      %c0_42 = arith.constant 0 : index
      %c0_43 = arith.constant 0 : index
      %104 = vector.load %arg4[%c0_41, %c0_42, %c0_43] : memref<1x8x32xf32, #tpu.memory_space<vmem>>, vector<1x8x32xf32>
      %105 = vector.shape_cast %104 : vector<1x8x32xf32> to vector<8x32xf32>
      %c0_44 = arith.constant 0 : index
      %c0_45 = arith.constant 0 : index
      %c0_46 = arith.constant 0 : index
      %106 = vector.load %arg5[%c0_44, %c0_45, %c0_46] : memref<1x8x32xf32, #tpu.memory_space<vmem>>, vector<1x8x32xf32>
      %107 = vector.shape_cast %106 : vector<1x8x32xf32> to vector<8x32xf32>
      %108 = arith.index_cast %arg2 : i32 to index
      %c0_47 = arith.constant 0 : index
      %c0_48 = arith.constant 0 : index
      %109 = vector.load %arg8[%108, %c0_47, %c0_48] : memref<1x32x32xf32, #tpu.memory_space<vmem>>, vector<1x32x32xf32>
      %110 = vector.shape_cast %109 : vector<1x32x32xf32> to vector<32x32xf32>
      %cst_49 = arith.constant dense<0.000000e+00> : vector<8x32xf32>
      %111 = tpu.matmul %105, %110, %cst_49 {dimension_numbers = #tpu.dot_dimension_numbers<[1], [0], [0], [1], [0, 0, 1, 1], [], []>} : vector<8x32xf32>, vector<32x32xf32>, vector<8x32xf32> -> vector<8x32xf32>
      %112 = arith.index_cast %arg2 : i32 to index
      %c0_50 = arith.constant 0 : index
      %c0_51 = arith.constant 0 : index
      %113 = vector.load %arg12[%112, %c0_50, %c0_51] : memref<1x1x32xf32, #tpu.memory_space<vmem>>, vector<1x1x32xf32>
      %114 = vector.shape_cast %113 : vector<1x1x32xf32> to vector<1x32xf32>
      %115 = vector.broadcast %114 : vector<1x32xf32> to vector<8x32xf32>
      %116 = arith.addf %111, %115 : vector<8x32xf32>
      %117 = arith.index_cast %arg2 : i32 to index
      %c0_52 = arith.constant 0 : index
      %c0_53 = arith.constant 0 : index
      %118 = vector.load %arg9[%117, %c0_52, %c0_53] : memref<1x32x32xf32, #tpu.memory_space<vmem>>, vector<1x32x32xf32>
      %119 = vector.shape_cast %118 : vector<1x32x32xf32> to vector<32x32xf32>
      %cst_54 = arith.constant dense<0.000000e+00> : vector<8x32xf32>
      %120 = tpu.matmul %107, %119, %cst_54 {dimension_numbers = #tpu.dot_dimension_numbers<[1], [0], [0], [1], [0, 0, 1, 1], [], []>} : vector<8x32xf32>, vector<32x32xf32>, vector<8x32xf32> -> vector<8x32xf32>
      %121 = arith.index_cast %arg2 : i32 to index
      %c0_55 = arith.constant 0 : index
      %c0_56 = arith.constant 0 : index
      %122 = vector.load %arg13[%121, %c0_55, %c0_56] : memref<1x1x32xf32, #tpu.memory_space<vmem>>, vector<1x1x32xf32>
      %123 = vector.shape_cast %122 : vector<1x1x32xf32> to vector<1x32xf32>
      %124 = vector.broadcast %123 : vector<1x32xf32> to vector<8x32xf32>
      %125 = arith.addf %120, %124 : vector<8x32xf32>
      %126 = arith.index_cast %arg2 : i32 to index
      %c0_57 = arith.constant 0 : index
      %c0_58 = arith.constant 0 : index
      %127 = vector.load %arg17[%126, %c0_57, %c0_58] : memref<1x8x32xf32, #tpu.memory_space<vmem>>, vector<1x8x32xf32>
      %128 = vector.shape_cast %127 : vector<1x8x32xf32> to vector<8x32xf32>
      %129 = vector.shape_cast %116 : vector<8x32xf32> to vector<1x8x32xf32>
      tpu.vector_store %arg17[%126, %c0_57, %c0_58], %129 {strides = array<i32>} : memref<1x8x32xf32, #tpu.memory_space<vmem>>, vector<1x8x32xf32>,
      %130 = arith.index_cast %arg2 : i32 to index
      %c0_59 = arith.constant 0 : index
      %c0_60 = arith.constant 0 : index
      %131 = vector.load %arg18[%130, %c0_59, %c0_60] : memref<1x8x32xf32, #tpu.memory_space<vmem>>, vector<1x8x32xf32>
      %132 = vector.shape_cast %131 : vector<1x8x32xf32> to vector<8x32xf32>
      %133 = vector.shape_cast %125 : vector<8x32xf32> to vector<1x8x32xf32>
      tpu.vector_store %arg18[%130, %c0_59, %c0_60], %133 {strides = array<i32>} : memref<1x8x32xf32, #tpu.memory_space<vmem>>, vector<1x8x32xf32>,
    } else {
    }
    %c0 = arith.constant 0 : index
    %c0_3 = arith.constant 0 : index
    %c0_4 = arith.constant 0 : index
    %6 = vector.load %arg3[%c0, %c0_3, %c0_4] : memref<1x8x32xf32, #tpu.memory_space<vmem>>, vector<1x8x32xf32>
    %7 = vector.shape_cast %6 : vector<1x8x32xf32> to vector<8x32xf32>
    %8 = arith.index_cast %arg2 : i32 to index
    %c0_5 = arith.constant 0 : index
    %c0_6 = arith.constant 0 : index
    %9 = vector.load %arg7[%8, %c0_5, %c0_6] : memref<1x32x32xf32, #tpu.memory_space<vmem>>, vector<1x32x32xf32>
    %10 = vector.shape_cast %9 : vector<1x32x32xf32> to vector<32x32xf32>
    %cst = arith.constant dense<0.000000e+00> : vector<8x32xf32>
    %11 = tpu.matmul %7, %10, %cst {dimension_numbers = #tpu.dot_dimension_numbers<[1], [0], [0], [1], [0, 0, 1, 1], [], []>} : vector<8x32xf32>, vector<32x32xf32>, vector<8x32xf32> -> vector<8x32xf32>
    %12 = arith.index_cast %arg2 : i32 to index
    %c0_7 = arith.constant 0 : index
    %c0_8 = arith.constant 0 : index
    %13 = vector.load %arg11[%12, %c0_7, %c0_8] : memref<1x1x32xf32, #tpu.memory_space<vmem>>, vector<1x1x32xf32>
    %14 = vector.shape_cast %13 : vector<1x1x32xf32> to vector<1x32xf32>
    %15 = vector.broadcast %14 : vector<1x32xf32> to vector<8x32xf32>
    %16 = arith.addf %11, %15 : vector<8x32xf32>
    %17 = arith.index_cast %arg2 : i32 to index
    %c0_9 = arith.constant 0 : index
    %c0_10 = arith.constant 0 : index
    %18 = vector.load %arg17[%17, %c0_9, %c0_10] : memref<1x8x32xf32, #tpu.memory_space<vmem>>, vector<1x8x32xf32>
    %19 = vector.shape_cast %18 : vector<1x8x32xf32> to vector<8x32xf32>
    %20 = arith.index_cast %arg2 : i32 to index
    %c0_11 = arith.constant 0 : index
    %c0_12 = arith.constant 0 : index
    %21 = vector.load %arg18[%20, %c0_11, %c0_12] : memref<1x8x32xf32, #tpu.memory_space<vmem>>, vector<1x8x32xf32>
    %22 = vector.shape_cast %21 : vector<1x8x32xf32> to vector<8x32xf32>
    %c0_13 = arith.constant 0 : index
    %c0_14 = arith.constant 0 : index
    %c0_15 = arith.constant 0 : index
    %23 = vector.load %arg6[%c0_13, %c0_14, %c0_15] : memref<1x1x8xf32, #tpu.memory_space<vmem>>, vector<1x1x8xf32>
    %24 = vector.shape_cast %23 : vector<1x1x8xf32> to vector<1x8xf32>
    %25 = vector.extract_strided_slice %16 {offsets = [0, 0], sizes = [8, 8], strides = [1, 1]} : vector<8x32xf32> to vector<8x8xf32>
    %26 = vector.extract_strided_slice %19 {offsets = [0, 0], sizes = [8, 8], strides = [1, 1]} : vector<8x32xf32> to vector<8x8xf32>
    %27 = vector.extract_strided_slice %22 {offsets = [0, 0], sizes = [8, 8], strides = [1, 1]} : vector<8x32xf32> to vector<8x8xf32>
    %cst_16 = arith.constant dense<0.000000e+00> : vector<8x8xf32>
    %28 = tpu.matmul %25, %26, %cst_16 {dimension_numbers = #tpu.dot_dimension_numbers<[1], [1], [0], [0], [0, 0, 1, 0], [], []>} : vector<8x8xf32>, vector<8x8xf32>, vector<8x8xf32> -> vector<8x8xf32>
    %29 = vector.broadcast %24 : vector<1x8xf32> to vector<8x8xf32>
    %30 = arith.addf %28, %29 : vector<8x8xf32>
    %cst_17 = arith.constant dense<0xFF800000> : vector<8xf32>
    %31 = vector.multi_reduction <maximumf>, %30, %cst_17 [1] : vector<8x8xf32> to vector<8xf32>
    %32 = vector.shape_cast %31 : vector<8xf32> to vector<8x1xf32>
    %33 = vector.broadcast %32 : vector<8x1xf32> to vector<8x8xf32>
    %34 = arith.subf %30, %33 : vector<8x8xf32>
    %35 = math.exp %34 : vector<8x8xf32>
    %cst_18 = arith.constant dense<0.000000e+00> : vector<8xf32>
    %36 = vector.multi_reduction <add>, %35, %cst_18 [1] : vector<8x8xf32> to vector<8xf32>
    %37 = vector.shape_cast %36 : vector<8xf32> to vector<8x1xf32>
    %cst_19 = arith.constant dense<0.000000e+00> : vector<8x8xf32>
    %38 = tpu.matmul %35, %27, %cst_19 {dimension_numbers = #tpu.dot_dimension_numbers<[1], [0], [0], [1], [0, 0, 1, 1], [], []>} : vector<8x8xf32>, vector<8x8xf32>, vector<8x8xf32> -> vector<8x8xf32>
    %39 = tpu.reciprocal %37 : vector<8x1xf32> -> vector<8x1xf32>
    %40 = vector.broadcast %39 : vector<8x1xf32> to vector<8x8xf32>
    %41 = arith.mulf %38, %40 : vector<8x8xf32>
    %42 = vector.extract_strided_slice %16 {offsets = [0, 8], sizes = [8, 8], strides = [1, 1]} : vector<8x32xf32> to vector<8x8xf32>
    %43 = vector.extract_strided_slice %19 {offsets = [0, 8], sizes = [8, 8], strides = [1, 1]} : vector<8x32xf32> to vector<8x8xf32>
    %44 = vector.extract_strided_slice %22 {offsets = [0, 8], sizes = [8, 8], strides = [1, 1]} : vector<8x32xf32> to vector<8x8xf32>
    %cst_20 = arith.constant dense<0.000000e+00> : vector<8x8xf32>
    %45 = tpu.matmul %42, %43, %cst_20 {dimension_numbers = #tpu.dot_dimension_numbers<[1], [1], [0], [0], [0, 0, 1, 0], [], []>} : vector<8x8xf32>, vector<8x8xf32>, vector<8x8xf32> -> vector<8x8xf32>
    %46 = vector.broadcast %24 : vector<1x8xf32> to vector<8x8xf32>
    %47 = arith.addf %45, %46 : vector<8x8xf32>
    %cst_21 = arith.constant dense<0xFF800000> : vector<8xf32>
    %48 = vector.multi_reduction <maximumf>, %47, %cst_21 [1] : vector<8x8xf32> to vector<8xf32>
    %49 = vector.shape_cast %48 : vector<8xf32> to vector<8x1xf32>
    %50 = vector.broadcast %49 : vector<8x1xf32> to vector<8x8xf32>
    %51 = arith.subf %47, %50 : vector<8x8xf32>
    %52 = math.exp %51 : vector<8x8xf32>
    %cst_22 = arith.constant dense<0.000000e+00> : vector<8xf32>
    %53 = vector.multi_reduction <add>, %52, %cst_22 [1] : vector<8x8xf32> to vector<8xf32>
    %54 = vector.shape_cast %53 : vector<8xf32> to vector<8x1xf32>
    %cst_23 = arith.constant dense<0.000000e+00> : vector<8x8xf32>
    %55 = tpu.matmul %52, %44, %cst_23 {dimension_numbers = #tpu.dot_dimension_numbers<[1], [0], [0], [1], [0, 0, 1, 1], [], []>} : vector<8x8xf32>, vector<8x8xf32>, vector<8x8xf32> -> vector<8x8xf32>
    %56 = tpu.reciprocal %54 : vector<8x1xf32> -> vector<8x1xf32>
    %57 = vector.broadcast %56 : vector<8x1xf32> to vector<8x8xf32>
    %58 = arith.mulf %55, %57 : vector<8x8xf32>
    %59 = vector.extract_strided_slice %16 {offsets = [0, 16], sizes = [8, 8], strides = [1, 1]} : vector<8x32xf32> to vector<8x8xf32>
    %60 = vector.extract_strided_slice %19 {offsets = [0, 16], sizes = [8, 8], strides = [1, 1]} : vector<8x32xf32> to vector<8x8xf32>
    %61 = vector.extract_strided_slice %22 {offsets = [0, 16], sizes = [8, 8], strides = [1, 1]} : vector<8x32xf32> to vector<8x8xf32>
    %cst_24 = arith.constant dense<0.000000e+00> : vector<8x8xf32>
    %62 = tpu.matmul %59, %60, %cst_24 {dimension_numbers = #tpu.dot_dimension_numbers<[1], [1], [0], [0], [0, 0, 1, 0], [], []>} : vector<8x8xf32>, vector<8x8xf32>, vector<8x8xf32> -> vector<8x8xf32>
    %63 = vector.broadcast %24 : vector<1x8xf32> to vector<8x8xf32>
    %64 = arith.addf %62, %63 : vector<8x8xf32>
    %cst_25 = arith.constant dense<0xFF800000> : vector<8xf32>
    %65 = vector.multi_reduction <maximumf>, %64, %cst_25 [1] : vector<8x8xf32> to vector<8xf32>
    %66 = vector.shape_cast %65 : vector<8xf32> to vector<8x1xf32>
    %67 = vector.broadcast %66 : vector<8x1xf32> to vector<8x8xf32>
    %68 = arith.subf %64, %67 : vector<8x8xf32>
    %69 = math.exp %68 : vector<8x8xf32>
    %cst_26 = arith.constant dense<0.000000e+00> : vector<8xf32>
    %70 = vector.multi_reduction <add>, %69, %cst_26 [1] : vector<8x8xf32> to vector<8xf32>
    %71 = vector.shape_cast %70 : vector<8xf32> to vector<8x1xf32>
    %cst_27 = arith.constant dense<0.000000e+00> : vector<8x8xf32>
    %72 = tpu.matmul %69, %61, %cst_27 {dimension_numbers = #tpu.dot_dimension_numbers<[1], [0], [0], [1], [0, 0, 1, 1], [], []>} : vector<8x8xf32>, vector<8x8xf32>, vector<8x8xf32> -> vector<8x8xf32>
    %73 = tpu.reciprocal %71 : vector<8x1xf32> -> vector<8x1xf32>
    %74 = vector.broadcast %73 : vector<8x1xf32> to vector<8x8xf32>
    %75 = arith.mulf %72, %74 : vector<8x8xf32>
    %76 = vector.extract_strided_slice %16 {offsets = [0, 24], sizes = [8, 8], strides = [1, 1]} : vector<8x32xf32> to vector<8x8xf32>
    %77 = vector.extract_strided_slice %19 {offsets = [0, 24], sizes = [8, 8], strides = [1, 1]} : vector<8x32xf32> to vector<8x8xf32>
    %78 = vector.extract_strided_slice %22 {offsets = [0, 24], sizes = [8, 8], strides = [1, 1]} : vector<8x32xf32> to vector<8x8xf32>
    %cst_28 = arith.constant dense<0.000000e+00> : vector<8x8xf32>
    %79 = tpu.matmul %76, %77, %cst_28 {dimension_numbers = #tpu.dot_dimension_numbers<[1], [1], [0], [0], [0, 0, 1, 0], [], []>} : vector<8x8xf32>, vector<8x8xf32>, vector<8x8xf32> -> vector<8x8xf32>
    %80 = vector.broadcast %24 : vector<1x8xf32> to vector<8x8xf32>
    %81 = arith.addf %79, %80 : vector<8x8xf32>
    %cst_29 = arith.constant dense<0xFF800000> : vector<8xf32>
    %82 = vector.multi_reduction <maximumf>, %81, %cst_29 [1] : vector<8x8xf32> to vector<8xf32>
    %83 = vector.shape_cast %82 : vector<8xf32> to vector<8x1xf32>
    %84 = vector.broadcast %83 : vector<8x1xf32> to vector<8x8xf32>
    %85 = arith.subf %81, %84 : vector<8x8xf32>
    %86 = math.exp %85 : vector<8x8xf32>
    %cst_30 = arith.constant dense<0.000000e+00> : vector<8xf32>
    %87 = vector.multi_reduction <add>, %86, %cst_30 [1] : vector<8x8xf32> to vector<8xf32>
    %88 = vector.shape_cast %87 : vector<8xf32> to vector<8x1xf32>
    %cst_31 = arith.constant dense<0.000000e+00> : vector<8x8xf32>
    %89 = tpu.matmul %86, %78, %cst_31 {dimension_numbers = #tpu.dot_dimension_numbers<[1], [0], [0], [1], [0, 0, 1, 1], [], []>} : vector<8x8xf32>, vector<8x8xf32>, vector<8x8xf32> -> vector<8x8xf32>
    %90 = tpu.reciprocal %88 : vector<8x1xf32> -> vector<8x1xf32>
    %91 = vector.broadcast %90 : vector<8x1xf32> to vector<8x8xf32>
    %92 = arith.mulf %89, %91 : vector<8x8xf32>
    %93 = tpu.concatenate %41, %58, %75, %92 in 1 : vector<8x8xf32>, vector<8x8xf32>, vector<8x8xf32>, vector<8x8xf32> -> vector<8x32xf32>
    %c0_32 = arith.constant 0 : index
    %c0_33 = arith.constant 0 : index
    %94 = vector.load %arg16[%c0_32, %c0_33] : memref<8x32xf32, #tpu.memory_space<vmem>>, vector<8x32xf32>
    %95 = arith.index_cast %arg2 : i32 to index
    %c0_34 = arith.constant 0 : index
    %c0_35 = arith.constant 0 : index
    %96 = vector.load %arg10[%95, %c0_34, %c0_35] : memref<1x32x32xf32, #tpu.memory_space<vmem>>, vector<1x32x32xf32>
    %97 = vector.shape_cast %96 : vector<1x32x32xf32> to vector<32x32xf32>
    %cst_36 = arith.constant dense<0.000000e+00> : vector<8x32xf32>
    %98 = tpu.matmul %93, %97, %cst_36 {dimension_numbers = #tpu.dot_dimension_numbers<[1], [0], [0], [1], [0, 0, 1, 1], [], []>} : vector<8x32xf32>, vector<32x32xf32>, vector<8x32xf32> -> vector<8x32xf32>
    %99 = arith.addf %94, %98 : vector<8x32xf32>
    %c0_37 = arith.constant 0 : index
    %c0_38 = arith.constant 0 : index
    %100 = vector.load %arg16[%c0_37, %c0_38] : memref<8x32xf32, #tpu.memory_space<vmem>>, vector<8x32xf32>
    tpu.vector_store %arg16[%c0_37, %c0_38], %99 {strides = array<i32>} : memref<8x32xf32, #tpu.memory_space<vmem>>, vector<8x32xf32>,
    %c0_i32_39 = arith.constant 0 : i32
    %101 = arith.cmpi eq, %arg2, %c0_i32_39 : i32
    %102 = arith.extui %101 : i1 to i32
    %c0_i32_40 = arith.constant 0 : i32
    %103 = arith.cmpi ne, %102, %c0_i32_40 : i32
    scf.if %103 {
      %c0_41 = arith.constant 0 : index
      %c0_42 = arith.constant 0 : index
      %104 = vector.load %arg16[%c0_41, %c0_42] : memref<8x32xf32, #tpu.memory_space<vmem>>, vector<8x32xf32>
      %c0_43 = arith.constant 0 : index
      %c0_44 = arith.constant 0 : index
      %c0_45 = arith.constant 0 : index
      %105 = vector.load %arg15[%c0_43, %c0_44, %c0_45] : memref<1x8x32xf32, #tpu.memory_space<vmem>>, vector<1x8x32xf32>
      %106 = vector.shape_cast %105 : vector<1x8x32xf32> to vector<8x32xf32>
      %107 = vector.shape_cast %104 : vector<8x32xf32> to vector<1x8x32xf32>
      tpu.vector_store %arg15[%c0_43, %c0_44, %c0_45], %107 {strides = array<i32>} : memref<1x8x32xf32, #tpu.memory_space<vmem>>, vector<1x8x32xf32>,
    } else {
    }
    return
  }
  func.func @transform_0(%arg0: i32, %arg1: i32, %arg2: i32) -> (i32, i32, i32) {
    %c0_i32 = arith.constant 0 : i32
    %c0_i32_0 = arith.constant 0 : i32
    return %arg0, %arg1, %c0_i32 : i32, i32, i32
  }
  func.func @transform_1(%arg0: i32, %arg1: i32, %arg2: i32) -> (i32, i32, i32) {
    %c0_i32 = arith.constant 0 : i32
    %c0_i32_0 = arith.constant 0 : i32
    %c0_i32_1 = arith.constant 0 : i32
    return %arg0, %c0_i32, %c0_i32_0 : i32, i32, i32
  }
  func.func @transform_2(%arg0: i32, %arg1: i32, %arg2: i32) -> (i32, i32, i32) {
    %c0_i32 = arith.constant 0 : i32
    %c0_i32_0 = arith.constant 0 : i32
    %c0_i32_1 = arith.constant 0 : i32
    return %arg0, %c0_i32, %c0_i32_0 : i32, i32, i32
  }
  func.func @transform_3(%arg0: i32, %arg1: i32, %arg2: i32) -> (i32, i32, i32) {
    %c0_i32 = arith.constant 0 : i32
    %c0_i32_0 = arith.constant 0 : i32
    %c0_i32_1 = arith.constant 0 : i32
    return %arg0, %c0_i32, %c0_i32_0 : i32, i32, i32
  }
  func.func @transform_4(%arg0: i32, %arg1: i32, %arg2: i32) -> (i32, i32, i32) {
    %c0_i32 = arith.constant 0 : i32
    %c0_i32_0 = arith.constant 0 : i32
    %c0_i32_1 = arith.constant 0 : i32
    %c0_i32_2 = arith.constant 0 : i32
    return %c0_i32, %c0_i32_0, %c0_i32_1 : i32, i32, i32
  }
  func.func @transform_5(%arg0: i32, %arg1: i32, %arg2: i32) -> (i32, i32, i32) {
    %c0_i32 = arith.constant 0 : i32
    %c0_i32_0 = arith.constant 0 : i32
    %c0_i32_1 = arith.constant 0 : i32
    %c0_i32_2 = arith.constant 0 : i32
    return %c0_i32, %c0_i32_0, %c0_i32_1 : i32, i32, i32
  }
  func.func @transform_6(%arg0: i32, %arg1: i32, %arg2: i32) -> (i32, i32, i32) {
    %c0_i32 = arith.constant 0 : i32
    %c0_i32_0 = arith.constant 0 : i32
    %c0_i32_1 = arith.constant 0 : i32
    %c0_i32_2 = arith.constant 0 : i32
    return %c0_i32, %c0_i32_0, %c0_i32_1 : i32, i32, i32
  }
  func.func @transform_7(%arg0: i32, %arg1: i32, %arg2: i32) -> (i32, i32, i32) {
    %c0_i32 = arith.constant 0 : i32
    %c0_i32_0 = arith.constant 0 : i32
    %c0_i32_1 = arith.constant 0 : i32
    %c0_i32_2 = arith.constant 0 : i32
    return %c0_i32, %c0_i32_0, %c0_i32_1 : i32, i32, i32
  }
  func.func @transform_8(%arg0: i32, %arg1: i32, %arg2: i32) -> (i32, i32, i32) {
    %c0_i32 = arith.constant 0 : i32
    %c0_i32_0 = arith.constant 0 : i32
    %c0_i32_1 = arith.constant 0 : i32
    %c0_i32_2 = arith.constant 0 : i32
    return %c0_i32, %c0_i32_0, %c0_i32_1 : i32, i32, i32
  }
  func.func @transform_9(%arg0: i32, %arg1: i32, %arg2: i32) -> (i32, i32, i32) {
    %c0_i32 = arith.constant 0 : i32
    %c0_i32_0 = arith.constant 0 : i32
    %c0_i32_1 = arith.constant 0 : i32
    %c0_i32_2 = arith.constant 0 : i32
    return %c0_i32, %c0_i32_0, %c0_i32_1 : i32, i32, i32
  }
  func.func @transform_10(%arg0: i32, %arg1: i32, %arg2: i32) -> (i32, i32, i32) {
    %c0_i32 = arith.constant 0 : i32
    %c0_i32_0 = arith.constant 0 : i32
    %c0_i32_1 = arith.constant 0 : i32
    %c0_i32_2 = arith.constant 0 : i32
    return %c0_i32, %c0_i32_0, %c0_i32_1 : i32, i32, i32
  }
  func.func @transform_11(%arg0: i32, %arg1: i32, %arg2: i32) -> (i32, i32) {
    %c0_i32 = arith.constant 0 : i32
    %c0_i32_0 = arith.constant 0 : i32
    %c0_i32_1 = arith.constant 0 : i32
    return %c0_i32, %c0_i32_0 : i32, i32
  }
  func.func @transform_12(%arg0: i32, %arg1: i32, %arg2: i32) -> (i32, i32, i32) {
    %c0_i32 = arith.constant 0 : i32
    %c0_i32_0 = arith.constant 0 : i32
    return %arg0, %arg1, %c0_i32 : i32, i32, i32
  }
}

</mosaic_0001>

<bundles_post_ra>
// kernel: tpu_custom_call.1
= control target key start
LH: loop header
LB: loop body
LE: loop exit
PB: predicated region body
PF: predicated region fallthrough
CT: control target
= control target key end

     0   :  { %s2909_s0 = inlined_call_operand.hbm [shape: f32[2,8,32], index: 0, kind: input, shape index: {}]   ;;  %s2910_s1 = inlined_call_operand.hbm [shape: f32[2,8,32], index: 1, kind: input, shape index: {}]   ;;  %s2911_s2 = inlined_call_operand.hbm [shape: f32[2,8,32], index: 2, kind: input, shape index: {}]   ;;  %s2912_s3 = inlined_call_operand.vmem [shape: f32[2,1,8], index: 3, kind: input, shape index: {}]   ;;  %s2913_s4 = inlined_call_operand.hbm [shape: f32[1,32,32], index: 4, kind: input, shape index: {}]   ;;  %s2914_s5 = inlined_call_operand.hbm [shape: f32[1,32,32], index: 5, kind: input, shape index: {}]   ;;  %s2915_s6 = inlined_call_operand.hbm [shape: f32[1,32,32], index: 6, kind: input, shape index: {}]   ;;  %s2916_s7 = inlined_call_operand.hbm [shape: f32[1,32,32], index: 7, kind: input, shape index: {}]   ;;  %s2917_s8 = inlined_call_operand.vmem [shape: f32[1,1,32], index: 8, kind: input, shape index: {}]   ;;  %s2918_s9 = inlined_call_operand.vmem [shape: f32[1,1,32], index: 9, kind: input, shape index: {}]   ;;  %s2919_s10 = inlined_call_operand.vmem [shape: f32[1,1,32], index: 10, kind: input, shape index: {}]   ;;  %s2920_s11 = inlined_call_operand.vmem [shape: f32[1,32], index: 11, kind: input, shape index: {}]   ;;  %s2921_s12 = inlined_call_operand.hbm [shape: f32[2,8,32], index: 12, kind: output, shape index: {}]  }
   0x1   :  { %2940 = sst [smem:[#allocation30_spill]] %s2910_s1 }
   0x2   :  { %2941 = sst [smem:[#allocation31_spill]] %s2912_s3 }
   0x3   :  { %2942 = sst [smem:[#allocation32_spill]] %s2913_s4 }
   0x4   :  { %2943 = sst [smem:[#allocation33_spill]] %s2914_s5 }
   0x5   :  { %2944 = sst [smem:[#allocation34_spill]] %s2915_s6 }
   0x6   :  { %2945 = sst [smem:[#allocation35_spill]] %s2920_s11 }
   0x7   :  { %2946 = sst [smem:[#allocation36_spill]] %s2921_s12 }
   0x8   :  { %17 = vsyncpa [#allocation6], 0 }
   0x9   :  { %19 = vsyncpa [#allocation6 + $0x1], 0 }
   0xa   :  { %20 = vsyncpa [#allocation9], 0 }
   0xb   :  { %22 = vsyncpa [#allocation9 + $0x1], 0 }
   0xc   :  { %23 = vsyncpa [#allocation12], 0 }
   0xd   :  { %24 = vsyncpa [#allocation15], 0 }
   0xe   :  { %25 = vsyncpa [#allocation7], 0 }
   0xf   :  { %27 = vsyncpa [#allocation7 + $0x1], 0  ;;  %s2534_s21 = smov 0   ;;  %s2536_s22 = smov 0  }
  0x10   :  { %s2538_s23 = smov 0   ;;  %s2540_s24 = smov 0  }
  0x11   :  { %s2542_s25 = smov 0   ;;  %s2544_s26 = smov 0  }
  0x12 LB: > { %2947 = sst [smem:[#allocation23_spill]] %s2429_s21  ;;  %s2565_s27 = sadd.s32 4294967295, %s2449_s26   ;;  %s2449_s26 = sphi %s2544_s26, %s33_s26   ;;  %s2445_s25 = sphi %s2542_s25, %s2988_s25   ;;  %s2441_s24 = sphi %s2540_s24, %s2987_s24   ;;  %s2437_s23 = sphi %s2538_s23, %s2991_s23   ;;  %s2433_s22 = sphi %s2536_s22, %s2990_s22   ;;  %s2429_s21 = sphi %s2534_s21, %s2989_s21  }
  0x13   : > { %2948 = sst [smem:[#allocation24_spill]] %s2445_s25  ;;  %p1864_p0 = scmp.ge.s32.totalorder %s2449_s26, 1 }
  0x14   : > { %2949 = sst [smem:[#allocation25_spill]] %s2449_s26  ;;  %p2936_p1 = scmp.eq.s32.totalorder %s2565_s27, 0 }
  0x15   : > { %p359_p2 = scmp.lt.s32.totalorder %s2449_s26, 3  ;;  %s2451_s29 = smov [#allocation11]  }
  0x16   : > { %s371_s30 = sshll.u32 %s2451_s29, 4  ;;  %s2452_s14 = smov [#allocation14]   ;;  %s372_s30 = int_to_ptr.vmem [resolvable:$true] %s371_s30 }
  0x17   : > { %p2570_p3 = pnand %p1864_p0, %p359_p2  ;;  %s397_s15 = sshll.u32 %s2452_s14, 4  ;;  %s398_s15 = int_to_ptr.vmem [resolvable:$true] %s397_s15 }
  0x18   : > { %s2180_s16 = scalar_lea.vmem %s372_s30, 512  ;;  %p2188_p11 = scmp.lt.s32.totalorder %s372_s30, %s372_s30 }
  0x19   : > { %p2054_p4 = pneg %p2570_p3  ;;  %p2181_p8 = scmp.ne.s32.totalorder %s372_s30, %s2180_s16 }
  0x1a   : > { %p2189_p12 = scmp.lt.s32.totalorder %s2180_s16, %s2180_s16 }
  0x1b   : > { %p2579_p6 = pnand %p2054_p4, %p2936_p1 }
  0x1c   : > { %p2190_p13 = por %p2189_p12, %p2188_p11 }
  0x1d   : > { %p2937_p7 = pneg %p2579_p6 }
  0x1f   : > { %p2183_p9 = pnand %p2181_p8, %p2937_p7 }
  0x21   : > { %p2184_p10 = pneg %p2183_p9 }
  0x23   : > { %p2191_p0 = pnand %p2190_p13, %p2184_p10 }
  0x25   : > { %2194 = shalt.err (!%p2191_p0)
}
  0x26   : > { %s2922_s17 = smov 128   ;;  %s2924_s18 = smov 8  }
  0x27   : > { %s2952_s4 = sld [smem:[#allocation32_spill]]  ;;  %s2206_s29 = scalar_lea.vmem %s398_s15, 512 }
  0x28   : > { %p2207_p2 = scmp.ne.s32.totalorder %s398_s15, %s2206_s29  ;;  %p2214_p9 = scmp.lt.s32.totalorder %s398_s15, %s398_s15 }
  0x29   : > { %p2215_p10 = scmp.lt.s32.totalorder %s2206_s29, %s2206_s29 }
  0x2a   : > { %p2209_p4 = pnand %p2207_p2, %p2937_p7 }
  0x2b   : > { %p2216_p11 = por %p2215_p10, %p2214_p9 }
  0x2c   : > { %p2210_p8 = pneg %p2209_p4 }
  0x2d   : > { %2057 = dma.hbm_to_vmem [thread:$0]  (!%p2579_p6), %s2952_s4, 512, %s372_s30, [#allocation12], %s2922_s17, %s2922_s17, %s2924_s18  }
  0x2e   : > { %p2217_p12 = pnand %p2216_p11, %p2210_p8 }
  0x30   : > { %2220 = shalt.err (!%p2217_p12)
}
  0x31   : > { %s2953_s6 = sld [smem:[#allocation34_spill]]  ;;  %s1863_s30 = sadd.s32 4294967294, %s2449_s26  }
  0x32   : > { %s52_s19 = sadd.s32 1, %s2445_s25  ;;  %s61_s20 = sadd.s32 1, %s2437_s23 }
  0x33   : > { %p54_p13 = scmp.ge.s32.totalorder %s52_s19, 2  ;;  %p68_p0 = scmp.ne.s32.totalorder %s2437_s23, %s2433_s22 }
  0x34   : > { %p69_p2 = scmp.eq.s32.totalorder %s2449_s26, 0  ;;  %p74_p8 = scmp.ne.s32.totalorder %s2433_s22, %s2429_s21 }
  0x35   : > { %s2993_s19 = smov (%p54_p13, %s52_s19), 0  ;;  %p346_p9 = scmp.eq.s32.totalorder %s2565_s27, 1 }
  0x36   : > { %2954 = sst [smem:[#allocation26_spill]] %s2993_s19  ;;  %p2615_p4 = por %p69_p2, %p68_p0 }
  0x37   : > { %2063 = dma.hbm_to_vmem [thread:$0]  (!%p2579_p6), %s2953_s6, 512, %s398_s15, [#allocation15], %s2922_s17, %s2922_s17, %s2924_s18  }
  0x38   : > { %s56_s15 = ssub.s32 %s2445_s25, %s2993_s19  ;;  %p2626_p11 = por %p2936_p1, %p74_p8 }
  0x39   : > { %p59_p10 = scmp.eq.s32.totalorder %s56_s15, 0  ;;  %p2630_p12 = por %p346_p9, %p68_p0 }
  0x3a   : > { %p352_p13 = scmp.eq.s32.totalorder %s1863_s30, 1  ;;  %p2085_p5 = scmp.lt.s32.totalorder %s2449_s26, 2 }
  0x3b   : > { %s2957_s16 = scalar_select %p2630_p12, 1, 0 }
  0x3c   : > { %s2635_s17 = scalar_select %p59_p10, %s2437_s23, %s61_s20  }
  0x3d   : > { %2958 = sst [smem:[#allocation27_spill]] %s2957_s16  ;;  %p2637_p2 = por %p352_p13, %p74_p8 }
  0x3e   : > { %2959 = sst [smem:[#allocation28_spill]] %s2635_s17  ;;  %s2931_s4 = sand.u32 1, %s2437_s23  }
  0x3f   : > { %s2960_s18 = scalar_select %p2637_p2, 1, 0 }
  0x40   : > { %s2644_s6 = sshll.u32 %s2445_s25, 7  ;;  %s2648_s15 = sshll.u32 %s2931_s4, 3 }
  0x41   : > { %2961 = sst [smem:[#allocation29_spill]] %s2960_s18  ;;  %p2652_p0 = pnand %p2085_p5, %p2615_p4 }
  0x42   : > { %s455_s30 = sand.u32 1, %s2449_s26   ;;  %s2963_s1 = sld [smem:[#allocation30_spill]] }
  0x43   : > { %s459_s21 = scalar_lea.vmem [#allocation8], %s2648_s15  ;;  %s2662_s12 = scalar_lea.sflag [#allocation9], %s455_s30 }
  0x44   : > { %s466_s25 = sshll.u32 %s459_s21, 4  ;;  %p2938_p8 = pneg %p2652_p0  ;;  %s467_s25 = int_to_ptr.vmem [resolvable:$true] %s466_s25 }
  0x45   : > { %s2234_s29 = scalar_lea.vmem %s467_s25, 128  ;;  %s2455_s4 = smov [#allocation8]  }
  0x46   : > { %p2235_p9 = scmp.ne.s32.totalorder %s467_s25, %s2234_s29  ;;  %s2239_s16 = sshll.u32 %s2455_s4, 4  ;;  %s2240_s16 = int_to_ptr.vmem [resolvable:$false] %s2239_s16 }
  0x47   : > { %s2241_s26 = scalar_lea.vmem %s2240_s16, 256  ;;  %p2242_p10 = scmp.lt.s32.totalorder %s467_s25, %s2240_s16 }
  0x48   : > { %s464_s18 = scalar_lea.hbm %s2963_s1, %s2644_s6  ;;  %p2237_p5 = pnand %p2235_p9, %p2938_p8 }
  0x49   : > { %p2243_p13 = scmp.lt.s32.totalorder %s2241_s26, %s2234_s29 }
  0x4a   : > { %p2238_p4 = pneg %p2237_p5 }
  0x4b   : > { %p2244_p1 = por %p2243_p13, %p2242_p10 }
  0x4d   : > { %p2245_p7 = pnand %p2244_p1, %p2238_p4 }
  0x4f   : > { %2248 = shalt.err (!%p2245_p7)
}
  0x50   : > { %2073 = dma.hbm_to_vmem [thread:$0]  (!%p2652_p0), %s464_s18, 128, %s467_s25, %s2662_s12  }
  0x51   : > { %s2456_s21 = smov [#allocation13]   ;;  %s2457_s30 = smov [#allocation16]  }
  0x52   : > { %s384_s17 = sshll.u32 %s2456_s21, 4  ;;  %s410_s20 = sshll.u32 %s2457_s30, 4  ;;  %s385_s17 = int_to_ptr.vmem [resolvable:$true] %s384_s17  ;;  %s411_s20 = int_to_ptr.vmem [resolvable:$true] %s410_s20 }
  0x53   : > { %s2260_s1 = scalar_lea.vmem %s385_s17, 512  ;;  %p2964_p5 = pneg %p2579_p6 }
  0x54   : > { %p2261_p9 = scmp.ne.s32.totalorder %s385_s17, %s2260_s1  ;;  %p2268_p12 = scmp.lt.s32.totalorder %s385_s17, %s385_s17 }
  0x55   : > { %p2269_p10 = scmp.lt.s32.totalorder %s2260_s1, %s2260_s1 }
  0x56   : > { %p2263_p8 = pnand %p2261_p9, %p2964_p5 }
  0x57   : > { %p2270_p1 = por %p2269_p10, %p2268_p12 }
  0x58   : > { %p2264_p2 = pneg %p2263_p8 }
  0x5a   : > { %p2271_p7 = pnand %p2270_p1, %p2264_p2 }
  0x5c   : > { %2274 = shalt.err (!%p2271_p7)
}
  0x5d   : > { %s2965_s4 = smov 8   ;;  %s2966_s25 = smov 128  }
  0x5e   : > { %s2967_s5 = sld [smem:[#allocation33_spill]]  ;;  %s2286_s16 = scalar_lea.vmem %s411_s20, 512 }
  0x5f   : > { %p2287_p4 = scmp.ne.s32.totalorder %s411_s20, %s2286_s16  ;;  %p2968_p8 = pmov %p2964_p5 }
  0x60   : > { %p2294_p12 = scmp.lt.s32.totalorder %s411_s20, %s411_s20  ;;  %p2295_p2 = scmp.lt.s32.totalorder %s2286_s16, %s2286_s16 }
  0x61   : > { %p2289_p13 = pnand %p2287_p4, %p2968_p8 }
  0x62   : > { %p2296_p5 = por %p2295_p2, %p2294_p12 }
  0x63   : > { %p2290_p9 = pneg %p2289_p13 }
  0x64   : > { %2060 = dma.hbm_to_vmem [thread:$0]  (!%p2579_p6), %s2967_s5, 512, %s385_s17, [#allocation12], %s2966_s25, %s2966_s25, %s2965_s4  }
  0x65   : > { %p2297_p10 = pnand %p2296_p5, %p2290_p9 }
  0x67   : > { %2300 = shalt.err (!%p2297_p10)
}
  0x68   : > { %2066 = dma.hbm_to_vmem [thread:$0]  (!%p2579_p6), %s2916_s7, 512, %s411_s20, [#allocation15], %s2966_s25, %s2966_s25, %s2965_s4  }
  0x69   : > { %s446_s30 = scalar_lea.hbm %s2909_s0, %s2644_s6  ;;  %s440_s26 = scalar_lea.vmem [#allocation5], %s2648_s15 }
  0x6a   : > { %s448_s18 = sshll.u32 %s440_s26, 4  ;;  %s482_s5 = scalar_lea.hbm %s2911_s2, %s2644_s6  ;;  %s449_s18 = int_to_ptr.vmem [resolvable:$true] %s448_s18 }
  0x6b   : > { %s2969_s11 = sand.u32 1, %s2437_s23   ;;  %s2314_s1 = scalar_lea.vmem %s449_s18, 128 }
  0x6c   : > { %s437_s3 = scalar_lea.sflag [#allocation6], %s2969_s11  ;;  %p2315_p1 = scmp.ne.s32.totalorder %s449_s18, %s2314_s1 }
  0x6d   : > { %p2970_p7 = pneg %p2652_p0  ;;  %s2458_s20 = smov [#allocation5]  }
  0x6e   : > { %s2319_s4 = sshll.u32 %s2458_s20, 4  ;;  %s2320_s4 = int_to_ptr.vmem [resolvable:$false] %s2319_s4 }
  0x6f   : > { %p2317_p4 = pnand %p2315_p1, %p2970_p7  ;;  %s2321_s25 = scalar_lea.vmem %s2320_s4, 256 }
  0x70   : > { %p2322_p6 = scmp.lt.s32.totalorder %s449_s18, %s2320_s4  ;;  %p2323_p13 = scmp.lt.s32.totalorder %s2321_s25, %s2314_s1 }
  0x71   : > { %p2318_p8 = pneg %p2317_p4 }
  0x72   : > { %p2324_p9 = por %p2323_p13, %p2322_p6 }
  0x74   : > { %p2325_p12 = pnand %p2324_p9, %p2318_p8 }
  0x76   : > { %2328 = shalt.err (!%p2325_p12)
}
  0x77   : > { %2070 = dma.hbm_to_vmem [thread:$0]  (!%p2652_p0), %s446_s30, 128, %s449_s18, %s437_s3  }
  0x78   : > { %s477_s11 = scalar_lea.vmem [#allocation10], %s2648_s15  ;;  %p2971_p5 = pmov %p2970_p7 }
  0x79   : > { %s484_s29 = sshll.u32 %s477_s11, 4  ;;  %s2459_s17 = smov [#allocation10]   ;;  %s485_s29 = int_to_ptr.vmem [resolvable:$true] %s484_s29 }
  0x7a   : > { %s2342_s21 = scalar_lea.vmem %s485_s29, 128  ;;  %s2347_s26 = sshll.u32 %s2459_s17, 4  ;;  %s2348_s26 = int_to_ptr.vmem [resolvable:$false] %s2347_s26 }
  0x7b   : > { %p2343_p2 = scmp.ne.s32.totalorder %s485_s29, %s2342_s21  ;;  %s2349_s13 = scalar_lea.vmem %s2348_s26, 256 }
  0x7c   : > { %p2350_p7 = scmp.lt.s32.totalorder %s485_s29, %s2348_s26  ;;  %p2351_p4 = scmp.lt.s32.totalorder %s2349_s13, %s2342_s21 }
  0x7d   : > { %p2345_p10 = pnand %p2343_p2, %p2971_p5 }
  0x7e   : > { %p2352_p8 = por %p2351_p4, %p2350_p7 }
  0x7f   : > { %p2346_p1 = pneg %p2345_p10 }
  0x81   : > { %p2353_p6 = pnand %p2352_p8, %p2346_p1 }
  0x83   : > { %2356 = shalt.err (!%p2353_p6)
}
  0x84   : > { %2076 = dma.hbm_to_vmem [thread:$0]  (!%p2652_p0), %s482_s5, 128, %s485_s29, %s2662_s12  }
  0x85   : > { %499 = sbr.rel (%p2570_p3) target bundleno = 1608 (0x648), region = 68  ;;  %s2725_s30 = sand.u32 (!%p2570_p3), 1, %s2433_s22  }
  0x86   : > { %s2728_s18 = sshll.u32 (!%p2570_p3), %s2725_s30, 3  ;;  %s502_s19 = scalar_lea.sflag (!%p2570_p3), [#allocation6], %s2725_s30 }
  0x87   : > { %s505_s16 = scalar_lea.vmem (!%p2570_p3), [#allocation5], %s2728_s18 }
  0x8a   : > { %2408 = dma.done.wait (%p2626_p11), %s502_s19, 128  }
  0x8b   : > { %2410 = vsyncadd (%p2626_p11), %s502_s19, 4294967168  ;;  %s510_s5 = sand.u32 1, %s2565_s27   ;;  %s514_s12 = scalar_lea.vmem [#allocation8], %s2728_s18 }
  0x8c   : > { %s511_s6 = scalar_lea.sflag [#allocation9], %s510_s5 }
  0x8d   : > { %2412 = dma.done.wait (%p2626_p11), %s511_s6, 256  }
  0x8e   : > { %2414 = vsyncadd (%p2626_p11), %s511_s6, 4294967040  ;;  %s523_s28 = scalar_lea.vmem [#allocation10], %s2728_s18  ;;  %p2972_p3 = scmp.eq.s32.totalorder %s2565_s27, 0 }
  0x90   : > { %2416 = dma.done.wait (%p2972_p3), [#allocation12], 1024   ;;  %p2973_p0 = pmov %p2972_p3 }
  0x92   : > { %2418 = vsyncadd (%p2973_p0), [#allocation12], 4294966272  ;;  %p2974_p13 = pmov %p2973_p0 }
  0x93   : > { %p2975_p9 = pmov %p2973_p0 }
  0x94   : > { %2420 = dma.done.wait (%p2974_p13), [#allocation15], 1024  }
  0x95   : > { %2422 = vsyncadd (%p2975_p9), [#allocation15], 4294966272  ;;  %v2460_v0 = vmov 0.0   ;;  %vm2461_vm0 = vmmov 0   ;;  %v620_v1 = vld [vmem:[#allocation13 + $0x18] sm:$0xff]  ;;  %v619_v2 = vld [vmem:[#allocation13 + $0x10] sm:$0xff] }
  0x96   : > { %1946 = vmatprep.subr.mxu0 %v2460_v0  ;;  %1954 = vmatprep.mubr.msk.f32.mxu0 %vm2461_vm0, %v2460_v0  ;;  %v618_v3 = vld [vmem:[#allocation13 + $0x8] sm:$0xff]  ;;  %v617_v4 = vld [vmem:[#allocation13] sm:$0xff]  ;;  %vm607_vm1 = vcmask 261120   ;;  %v800_v6 = vld [vmem:[#allocation11 + $0x18] sm:$0xff]  ;;  %vm895_vm2 = vcmask 64512   ;;  %s2462_s4 = smov 120  }
  0x97   : > { %1957 = vmatprep.subr.mxu1 %v2460_v0  ;;  %1965 = vmatprep.mubr.msk.f32.mxu1 %vm2461_vm0, %v2460_v0  ;;  %v613_v5 = vld [vmem:[%s514_s12] sm:$0xff]  ;;  %v799_v7 = vld [vmem:[#allocation11 + $0x10] sm:$0xff]  ;;  %v707_v11 = vld [vmem:[#allocation14 + $0x18] sm:$0xff]  ;;  %s2463_s25 = smov 112   ;;  %s2464_s11 = smov 104   ;;  %vm1565_vm3 = vcmask 130048  }
  0x98   : > { %1947 = vmatpush3.msra.mxu0 %v620_v1  ;;  %v798_v8 = vld [vmem:[#allocation11 + $0x8] sm:$0xff]  ;;  %v797_v9 = vld [vmem:[#allocation11] sm:$0xff]  ;;  %v794_v10 = vld [vmem:[%s505_s16] sm:$0xff]  ;;  %1958 = vmatpush3.msra.mxu1 %v707_v11  ;;  %p593_p11 = scmp.lt.s32.totalorder %s2441_s24, 1  ;;  %s2976_s3 = sld [smem:[#allocation31_spill]]  ;;  %vm1567_vm4 = vcmask 195584  }
  0x99   : > { %1948 = vmatprep.subr.mxu0 %v2460_v0  ;;  %1959 = vmatprep.subr.mxu1 %v2460_v0  ;;  %v706_v12 = vld [vmem:[#allocation14 + $0x10] sm:$0xff]  ;;  %v705_v13 = vld [vmem:[#allocation14 + $0x8] sm:$0xff]  ;;  %v704_v14 = vld [vmem:[#allocation14] sm:$0xff]  ;;  %s2977_s5 = sld [smem:[#allocation35_spill]]  ;;  %s2465_s6 = smov 8  }
  0x9a   : > { %1949 = vmatpush3.msra.mxu0 %v619_v2  ;;  %1960 = vmatpush3.msra.mxu1 %v706_v12  ;;  %v614_v15 = vld [vmem:[%s523_s28] sm:$0xff]  ;;  %s594_s17 = scalar_select %p593_p11, %s2441_s24, 1 }
  0x9b   : > { %1950 = vmatprep.subr.mxu0 %v2460_v0  ;;  %1961 = vmatprep.subr.mxu1 %v2460_v0  ;;  %v1886_v16 = vld [vmem:[%s2918_s9] ss:$0 sm:$0xff]  ;;  %s2466_s12 = smov 16   ;;  %s2467_s28 = smov 24  }
  0x9c   : > { %1951 = vmatpush3.msra.mxu0 %v618_v3  ;;  %1962 = vmatpush3.msra.mxu1 %v705_v13  ;;  %v1890_v20 = vld [vmem:[%s2917_s8] ss:$0 sm:$0xff]  ;;  %s2978_s27 = sld [smem:[#allocation27_spill]]  ;;  %s1907_s14 = sshll.u32 %s2441_s24, 7 }
  0x9d   : > { %1952 = vmatprep.subr.mxu0 %v2460_v0  ;;  %1963 = vmatprep.subr.mxu1 %v2460_v0  ;;  %v1888_v25 = vld [vmem:[%s2919_s10] ss:$0 sm:$0xff]  ;;  %s592_s1 = scalar_lea.vmem [#allocation17], %s2728_s18  ;;  %s1656_s21 = scalar_lea.sflag [#allocation7], %s2725_s30 }
  0x9e   : > { %1953 = vmatpush3.msra.mxu0 %v617_v4  ;;  %1964 = vmatpush3.msra.mxu1 %v704_v14  ;;  %s595_s15 = scalar_lea.vmem %s2976_s3, %s594_s17  ;;  %s1670_s20 = sshll.u32 %s592_s1, 4  ;;  %s1671_s20 = int_to_ptr.vmem [resolvable:$true] %s1670_s20 }
  0x9f   : > { %1955 = vmatmul.mubr.msk.f32.vlgmr.msra.gmra.mxu0 %vm607_vm1, %v613_v5  ;;  %1968 = vmatprep.subr.mxu0 %v2460_v0  ;;  %v1892_v35 = vld [vmem:[%s595_s15] ss:$0 sm:$0xff]  ;;  %s2357_s17 = scalar_lea.vmem %s1671_s20, 128  ;;  %s2468_s26 = smov [#allocation17]  }
  0xa0   : > { %1969 = vmatpush3.msra.mxu0 %v800_v6  ;;  %1976 = vmatprep.mubr.msk.f32.mxu0 %vm2461_vm0, %v2460_v0  ;;  %p2358_p12 = scmp.ne.s32.totalorder %s1671_s20, %s2357_s17  ;;  %s2361_s13 = sshll.u32 %s2468_s26, 4  ;;  %s2362_s13 = int_to_ptr.vmem [resolvable:$false] %s2361_s13 }
  0xa1   : > { %1970 = vmatprep.subr.mxu0 %v2460_v0  ;;  %1966 = vmatmul.mubr.msk.f32.vlgmr.msra.gmra.mxu1 %vm607_vm1, %v614_v15  ;;  %s2363_s24 = scalar_lea.vmem %s2362_s13, 256  ;;  %p2364_p1 = scmp.lt.s32.totalorder %s1671_s20, %s2362_s13 }
  0xa2   : > { %1971 = vmatpush3.msra.mxu0 %v799_v7  ;;  %1979 = vmatprep.subr.mxu1 %v2460_v0  ;;  %p2980_p2 = scmp.ne.s32.totalorder %s2978_s27, 0  ;;  %p2365_p7 = scmp.lt.s32.totalorder %s2363_s24, %s2357_s17 }
  0xa3   : > { %1972 = vmatprep.subr.mxu0 %v2460_v0  ;;  %1981 = vmatprep.mubr.msk.f32.mxu1 %vm2461_vm0, %v2460_v0 }
  0xa4   : > { %1973 = vmatpush3.msra.mxu0 %v798_v8  ;;  %p2359_p5 = pnand %p2358_p12, %p2980_p2  ;;  %p2366_p4 = por %p2365_p7, %p2364_p1 }
  0xa5   : > { %1974 = vmatprep.subr.mxu0 %v2460_v0 }
  0xa6   : > { %1975 = vmatpush3.msra.mxu0 %v797_v9  ;;  %p2360_p10 = pneg %p2359_p5 }
  0xa7   : > { %1977 = vmatmul.mubr.msk.f32.vlgmr.msra.gmra.mxu0 %vm607_vm1, %v794_v10  ;;  %1999 = vmatprep.subr.mxu0 %v2460_v0 }
  0xa8   : > { %2001 = vmatprep.mubr.msk.f32.mxu0 %vm2461_vm0, %v2460_v0  ;;  %p2367_p8 = pnand %p2366_p4, %p2360_p10 }
 0x15f   : > { %v699_v17 = vpop.f32.mrf.mxu0 }
 0x160   : > { %v700_v18 = vadd.f32 %v1886_v16, %v699_v17  ;;  %v1574_v17 = vld [vmem:[#allocation16 + $0x18] sm:$0xff] }
 0x161   : > { %v1956_v19 = vpop.f32.mrf.mxu0  ;;  %v785_v26 = vpop.f32.mrf.mxu1 }
 0x162   : > { %791 = vst.msk [vmem:[#allocation3] sm:$0xff] %vm607_vm1, %v700_v18  ;;  %v786_v27 = vadd.f32 %v1888_v25, %v785_v26  ;;  %v1573_v19 = vld [vmem:[#allocation16 + $0x10] sm:$0xff] }
 0x163   : > { %v1967_v28 = vpop.f32.mrf.mxu1 }
 0x164   : > { %793 = vst.msk [vmem:[#allocation4] sm:$0xff] %vm607_vm1, %v786_v27 }
 0x167   : > { %v879_v21 = vpop.f32.mrf.mxu0 }
 0x168   : > { %v880_v22 = vadd.f32 %v1890_v20, %v879_v21  ;;  %v1572_v20 = vld [vmem:[#allocation16 + $0x8] sm:$0xff]  ;;  %v1571_v21 = vld [vmem:[#allocation16] sm:$0xff] }
 0x169   : > { %v885_v23 = vld [vmem:[#allocation3] sm:$0xff]  ;;  %v1978_v24 = vpop.f32.mrf.mxu0 }
 0x16a   : > { %1980 = vmatpush3.xpose.msk.msra.mxu1 %vm895_vm2, %v885_v23  ;;  %1056 = vrot.lane.b32.xlu1 %v880_v22, %s2462_s4 }
 0x16b   : > { %1984 = vmatprep.subr.mxu1 %v2460_v0  ;;  %v887_v29 = vld [vmem:[#allocation4] sm:$0xff] }
 0x16d   : > { %1982 = vmatmul.mubr.msk.f32.vlgmr.msra.gmra.mxu1 %vm895_vm2, %v880_v22 }
 0x16e   : > { %1224 = vrot.lane.b32.xlu1 %v885_v23, %s2463_s25  ;;  %1986 = vmatprep.mubr.msk.f32.mxu1 %vm2461_vm0, %v2460_v0 }
 0x16f   : > { %1985 = vmatpush3.msra.mxu1 %v887_v29 }
 0x170   : > { %1989 = vmatprep.subr.mxu1 %v2460_v0 }
 0x172   : > { %1222 = vrot.lane.b32.xlu1 %v880_v22, %s2463_s25 }
 0x176   : > { %1389 = vrot.lane.b32.xlu1 %v885_v23, %s2464_s11 }
 0x17a   : > { %1387 = vrot.lane.b32.xlu1 %v880_v22, %s2464_s11  ;;  %v1885_v22 = vld [vmem:[%s2977_s5] ss:$0 sm:$0xff] }
 0x17b   : > { %608 = vst.msk [vmem:[#allocation2] sm:$0xff] %vm607_vm1, %v1885_v22 }
 0x1dc   : > { %v1057_v30 = vpop.permute.xlu1 %1056 }
 0x1e0   : > { %v1225_v31 = vpop.permute.xlu1 %1224 }
 0x1e1   : > { %2000 = vmatpush3.xpose.msk.msra.mxu0 %vm895_vm2, %v1225_v31 }
 0x1e2   : > { %2009 = vmatprep.subr.mxu0 %v2460_v0 }
 0x1e4   : > { %v1223_v32 = vpop.permute.xlu1 %1222 }
 0x1e5   : > { %2002 = vmatmul.mubr.msk.f32.vlgmr.msra.gmra.mxu0 %vm895_vm2, %v1223_v32 }
 0x1e6   : > { %2011 = vmatprep.mubr.msk.f32.mxu0 %vm2461_vm0, %v2460_v0 }
 0x1e8   : > { %v1390_v33 = vpop.permute.xlu1 %1389 }
 0x1e9   : > { %2010 = vmatpush3.xpose.msk.msra.mxu0 %vm895_vm2, %v1390_v33 }
 0x1ea   : > { %2019 = vmatprep.subr.mxu0 %v2460_v0 }
 0x1ec   : > { %v1388_v34 = vpop.permute.xlu1 %1387 }
 0x1ed   : > { %2012 = vmatmul.mubr.msk.f32.vlgmr.msra.gmra.mxu0 %vm895_vm2, %v1388_v34 }
 0x1ee   : > { %2027 = vmatprep.mubr.msk.f32.mxu0 %vm2461_vm0, %v2460_v0  ;;  %2020 = vmatpush3.msra.mxu0 %v1574_v17 }
 0x1ef   : > { %2021 = vmatprep.subr.mxu0 %v2460_v0 }
 0x1f0   : > { %2022 = vmatpush3.msra.mxu0 %v1573_v19 }
 0x1f1   : > { %2023 = vmatprep.subr.mxu0 %v2460_v0 }
 0x1f2   : > { %2024 = vmatpush3.msra.mxu0 %v1572_v20 }
 0x1f3   : > { %2025 = vmatprep.subr.mxu0 %v2460_v0 }
 0x1f4   : > { %2026 = vmatpush3.msra.mxu0 %v1571_v21 }
 0x22d   : > { %v968_v36 = vpop.f32.mrf.mxu1 }
 0x22e   : > { %v969_v37 = vadd.f32 %v1892_v35, %v968_v36 }
 0x22f   : > { %v1983_v38 = vpop.f32.mrf.mxu1 }
 0x230   : > { %v972_v39 = vsel %vm895_vm2, %v969_v37, -inf }
 0x231   : > { %973 = vmax.xlane.f32.xlu0 %v972_v39 }
 0x247   : > { %1058 = vrot.lane.b32.xlu0 %v885_v23, %s2462_s4 }
 0x2a5   : > { %v1296_v40 = vpop.f32.mrf.mxu0 }
 0x2a6   : > { %v1297_v41 = vadd.f32 %v1892_v35, %v1296_v40 }
 0x2a7   : > { %v2003_v42 = vpop.f32.mrf.mxu0 }
 0x2a8   : > { %v1300_v43 = vsel %vm895_vm2, %v1297_v41, -inf }
 0x2a9   : > { %1301 = vmax.xlane.f32.xlu0 %v1300_v43  ;;  %v1569_v43 = vld [vmem:[#allocation2] sm:$0xff] }
 0x2ad   : > { %v1461_v44 = vpop.f32.mrf.mxu0 }
 0x2ae   : > { %v1462_v45 = vadd.f32 %v1892_v35, %v1461_v44 }
 0x2af   : > { %v2013_v46 = vpop.f32.mrf.mxu0 }
 0x2b0   : > { %v1465_v47 = vsel %vm895_vm2, %v1462_v45, -inf }
 0x2b1   : > { %1466 = vmax.xlane.f32.xlu1 %v1465_v47 }
 0x2ba   : > { %v974_v48 = vpop.xlane.xlu0 %973 }
 0x2bb   : > { %v975_v49 = vsub.f32 %v969_v37, %v974_v48 }
 0x2bd   : > { %v976_v50 = vmul.f32 1.442695, %v975_v49 }
 0x2be   : > { %v1059_v52 = vpop.permute.xlu0 %1058 }
 0x2bf   : > { %2153 = vpow2.f32 %v976_v50  ;;  %1144 = vrot.lane.b32.xlu0 %v887_v29, %s2462_s4 }
 0x2cc   : > { %v2154_v51 = vpop.eup %2153 }
 0x2cd   : > { %1987 = vmatmul.mubr.msk.f32.vlgmr.msra.gmra.mxu1 %vm895_vm2, %v2154_v51  ;;  %v978_v14 = vsel %vm895_vm2, %v2154_v51, 0.0 }
 0x2ce   : > { %1990 = vmatpush3.xpose.msk.msra.mxu1 %vm895_vm2, %v1059_v52  ;;  %1991 = vmatprep.mubr.msk.f32.mxu1 %vm2461_vm0, %v2460_v0 }
 0x2cf   : > { %1994 = vmatprep.subr.mxu1 %v2460_v0 }
 0x2d1   : > { %1992 = vmatmul.mubr.msk.f32.vlgmr.msra.gmra.mxu1 %vm895_vm2, %v1057_v30 }
 0x2d2   : > { %1996 = vmatprep.mubr.msk.f32.mxu1 %vm2461_vm0, %v2460_v0 }
 0x332   : > { %v1302_v53 = vpop.xlane.xlu0 %1301 }
 0x333   : > { %v1303_v61 = vsub.f32 %v1297_v41, %v1302_v53 }
 0x335   : > { %v1304_v62 = vmul.f32 1.442695, %v1303_v61 }
 0x336   : > { %v1145_v54 = vpop.permute.xlu0 %1144 }
 0x337   : > { %1995 = vmatpush3.msra.mxu1 %v1145_v54  ;;  %2155 = vpow2.f32 %v1304_v62 }
 0x338   : > { %2004 = vmatprep.subr.mxu1 %v2460_v0 }
 0x33a   : > { %v1467_v2 = vpop.xlane.xlu1 %1466 }
 0x33b   : > { %v1468_v3 = vsub.f32 %v1462_v45, %v1467_v2 }
 0x33d   : > { %v1469_v6 = vmul.f32 1.442695, %v1468_v3 }
 0x344   : > { %v2156_v63 = vpop.eup %2155 }
 0x345   : > { %v1306_v1 = vsel %vm895_vm2, %v2156_v63, 0.0 }
 0x38d   : > { %v2833_v55 = vpop.f32.mrf.mxu1 }
 0x38f   : > { %v1988_v56 = vpop.f32.mrf.mxu1 }
 0x391   : > { %v1130_v57 = vpop.f32.mrf.mxu1 }
 0x392   : > { %v1131_v58 = vadd.f32 %v1892_v35, %v1130_v57 }
 0x393   : > { %v1993_v59 = vpop.f32.mrf.mxu1 }
 0x394   : > { %v1134_v60 = vsel %vm895_vm2, %v1131_v58, -inf }
 0x395   : > { %1135 = vmax.xlane.f32.xlu1 %v1134_v60 }
 0x3a6   : > { %1309 = vrot.lane.b32.xlu1 %v887_v29, %s2463_s25 }
 0x3aa   : > { %1474 = vrot.lane.b32.xlu1 %v887_v29, %s2464_s11  ;;  %s2979_s11 = sld [smem:[#allocation36_spill]] }
 0x3b0   : > { %s2866_s29 = scalar_lea.hbm %s2979_s11, %s1907_s14 }
 0x3ce   : > { %1307 = vadd.xlane.f32.xlu1 %v1306_v1 }
 0x41e   : > { %v1136_v4 = vpop.xlane.xlu1 %1135 }
 0x41f   : > { %v1137_v5 = vsub.f32 %v1131_v58, %v1136_v4 }
 0x421   : > { %v1138_v7 = vmul.f32 1.442695, %v1137_v5 }
 0x422   : > { %v1310_v8 = vpop.permute.xlu1 %1309 }
 0x423   : > { %2157 = vpow2.f32 %v1138_v7 }
 0x424   : > { %2159 = vpow2.f32 %v1469_v6 }
 0x426   : > { %v1475_v12 = vpop.permute.xlu1 %1474 }
 0x430   : > { %v2158_v9 = vpop.eup %2157 }
 0x431   : > { %1997 = vmatmul.mubr.msk.f32.vlgmr.msra.gmra.mxu1 %vm895_vm2, %v2158_v9  ;;  %v1140_v10 = vsel %vm895_vm2, %v2158_v9, 0.0  ;;  %v2160_v11 = vpop.eup %2159 }
 0x432   : > { %2005 = vmatpush3.msra.mxu1 %v1310_v8  ;;  %1141 = vadd.xlane.f32.xlu0 %v1140_v10  ;;  %v1471_v13 = vsel %vm895_vm2, %v2160_v11, 0.0 }
 0x433   : > { %2006 = vmatprep.mubr.msk.f32.mxu1 %vm2461_vm0, %v2460_v0  ;;  %2014 = vmatprep.subr.mxu1 %v2460_v0 }
 0x435   : > { %2007 = vmatmul.mubr.msk.f32.vlgmr.msra.gmra.mxu1 %vm895_vm2, %v2156_v63 }
 0x436   : > { %2015 = vmatpush3.msra.mxu1 %v1475_v12  ;;  %1472 = vadd.xlane.f32.xlu0 %v1471_v13 }
 0x437   : > { %2016 = vmatprep.mubr.msk.f32.mxu1 %vm2461_vm0, %v2460_v0 }
 0x439   : > { %2017 = vmatmul.mubr.msk.f32.vlgmr.msra.gmra.mxu1 %vm895_vm2, %v2160_v11 }
 0x43a   : > { %979 = vadd.xlane.f32.xlu0 %v978_v14 }
 0x457   : > { %v1308_v16 = vpop.xlane.xlu1 %1307 }
 0x4bb   : > { %v1142_v15 = vpop.xlane.xlu0 %1141 }
 0x4bc   : > { %2161 = vrcp.f32 %v1142_v15 }
 0x4bd   : > { %2163 = vrcp.f32 %v1308_v16 }
 0x4bf   : > { %v1473_v18 = vpop.xlane.xlu0 %1472 }
 0x4c0   : > { %2165 = vrcp.f32 %v1473_v18 }
 0x4c3   : > { %v980_v34 = vpop.xlane.xlu0 %979 }
 0x4c4   : > { %2167 = vrcp.f32 %v980_v34 }
 0x4c9   : > { %v2162_v23 = vpop.eup %2161 }
 0x4ca   : > { %v2164_v27 = vpop.eup %2163 }
 0x4cd   : > { %v2166_v0 = vpop.eup %2165 }
 0x4d1   : > { %v2168_v35 = vpop.eup %2167 }
 0x4d2   : > { %v1055_v37 = vmul.f32 %v2168_v35, %v2833_v55 }
 0x4f1   : > { %v1216_v24 = vpop.f32.mrf.mxu1 }
 0x4f2   : > { %v1221_v25 = vmul.f32 %v2162_v23, %v1216_v24 }
 0x4f3   : > { %v1998_v26 = vpop.f32.mrf.mxu1 }
 0x4f4   : > { %1553 = vrot.lane.b32.xlu1 %v1221_v25, %s2465_s6 }
 0x4f5   : > { %v1381_v28 = vpop.f32.mrf.mxu1 }
 0x4f6   : > { %v1386_v29 = vmul.f32 %v2164_v27, %v1381_v28 }
 0x4f7   : > { %v2008_v30 = vpop.f32.mrf.mxu1 }
 0x4f8   : > { %1557 = vrot.lane.b32.xlu0 %v1386_v29, %s2466_s12 }
 0x4f9   : > { %v1546_v31 = vpop.f32.mrf.mxu1 }
 0x4fa   : > { %v1551_v32 = vmul.f32 %v2166_v0, %v1546_v31 }
 0x4fb   : > { %v2018_v33 = vpop.f32.mrf.mxu1 }
 0x4fc   : > { %1561 = vrot.lane.b32.xlu1 %v1551_v32, %s2467_s28 }
 0x566   : > { %v1554_v36 = vpop.permute.xlu1 %1553 }
 0x567   : > { %v1564_v39 = vsel %vm895_vm2, %v1055_v37, %v1554_v36 }
 0x56a   : > { %v1558_v38 = vpop.permute.xlu0 %1557 }
 0x56b   : > { %v1566_v40 = vsel %vm1565_vm3, %v1564_v39, %v1558_v38 }
 0x56e   : > { %v1562_v41 = vpop.permute.xlu1 %1561 }
 0x56f   : > { %v1568_v42 = vsel %vm1567_vm4, %v1566_v40, %v1562_v41 }
 0x570   : > { %2028 = vmatmul.mubr.msk.f32.vlgmr.msra.gmra.mxu0 %vm607_vm1, %v1568_v42 }
 0x630   : > { %v1644_v44 = vpop.f32.mrf.mxu0 }
 0x631   : > { %v1648_v45 = vadd.f32 %v1644_v44, %v1569_v43 }
 0x632   : > { %v2029_v46 = vpop.f32.mrf.mxu0 }
 0x633   : > { %1649 = vst.msk [vmem:[#allocation2] sm:$0xff] %vm607_vm1, %v1648_v45 }
 0x63a   : > { %v1653_v47 = vld [vmem:[#allocation2] sm:$0xff] }
 0x63b   : > { %1654 = vst.msk [vmem:[%s592_s1] sm:$0xff] %vm607_vm1, %v1653_v47 }
 0x63c   : > { %2370 = shalt.err (!%p2367_p8)
}
 0x63d   : > { %s2371_s18 = scalar_lea.hbm %s2866_s29, 128  ;;  %s2375_s15 = scalar_lea.hbm %s2979_s11, 256 }
 0x63e   : > { %p2372_p6 = scmp.ne.s32.totalorder %s2866_s29, %s2371_s18  ;;  %p2376_p13 = scmp.lt.s32.totalorder %s2866_s29, %s2979_s11 }
 0x63f   : > { %p2377_p9 = scmp.lt.s32.totalorder %s2375_s15, %s2371_s18 }
 0x640   : > { %p2373_p3 = pnand %p2372_p6, %p2980_p2 }
 0x641   : > { %p2378_p11 = por %p2377_p9, %p2376_p13 }
 0x642   : > { %p2374_p0 = pneg %p2373_p3 }
 0x644   : > { %p2379_p12 = pnand %p2378_p11, %p2374_p0 }
 0x646   : > { %2382 = shalt.err (!%p2379_p12)
}
 0x647   : > { %2052 = dma.vmem_to_hbm [thread:$0]  (%p2980_p2), %s1671_s20, 128, %s2866_s29, %s1656_s21  }
 0x648 PF: > { %s2981_s5 = sld [smem:[#allocation23_spill]] }
 0x649   : > { %s2982_s6 = sld [smem:[#allocation29_spill]] }
 0x64a   : > { %s2983_s12 = sld [smem:[#allocation25_spill]] }
 0x64e   : > { %s1682_s28 = sand.u32 1, %s2981_s5  }
 0x64f   : > { %p2984_p5 = scmp.ne.s32.totalorder %s2982_s6, 0  ;;  %s1683_s14 = scalar_lea.sflag [#allocation7], %s1682_s28 }
 0x650   : > { %p2985_p10 = scmp.ge.s32.totalorder %s2983_s12, 2 }
 0x652   : > { %p2078_p1 = pnand %p2985_p10, %p2984_p5 }
 0x654   : > { %p2079_p7 = pneg %p2078_p1 }
 0x656   : > { %2424 = dma.done.wait (%p2079_p7), %s1683_s14, 128  }
 0x657   : > { %2426 = vsyncadd (%p2079_p7), %s1683_s14, 4294967168  ;;  %s33_s26 = sadd.s32 1, %s2983_s12   ;;  %s2986_s27 = sld [smem:[#allocation28_spill]] }
 0x658   : > { %p30_p4 = scmp.ge.s32.totalorder %s33_s26, 4   ;;  %s2987_s24 = sld [smem:[#allocation24_spill]] }
 0x659   : > { %s2988_s25 = sld [smem:[#allocation26_spill]]  ;;  %s2989_s21 = smov %s2433_s22 }
 0x65a   : > { %s2990_s22 = smov %s2437_s23  ;;  %32 = sbr.rel (!%p30_p4) target bundleno = 18 (0x12), region = 179 }
 0x65d   : > { %s2991_s23 = smov %s2986_s27 }
 0x65f   :  { %1688 = vsyncpa [#allocation6], 1 }
 0x660   :  { %1690 = vsyncpa [#allocation6 + $0x1], 1 }
 0x661   :  { %1691 = vsyncpa [#allocation9], 1 }
 0x662   :  { %1693 = vsyncpa [#allocation9 + $0x1], 1 }
 0x663   :  { %1694 = vsyncpa [#allocation12], 1 }
 0x664   :  { %1695 = vsyncpa [#allocation15], 1 }
 0x665   :  { %1696 = vsyncpa [#allocation7], 1 }
 0x666   :  { %1698 = vsyncpa [#allocation7 + $0x1], 1 }

</bundles_post_ra>
